<compile_context>
chip_gen: v7x
topology: tpu7x:2x2x1
jax: 0.10.0
libtpu: 0.0.40
codegen_flags: <defaults>
</compile_context>

<pallas_src>
import jax
import jax.numpy as jnp
from jax.experimental import pallas as pl
from jax.experimental.pallas import tpu as pltpu

FE_CNN_UNUM = 128       # Conv1d output channels
FE_MLP_UNUM = 128       # per-branch MLP width
FE_LATENT_UNUM = 1024   # latent MLP width
CONV_K = 4              # Conv1d kernel size
CONV_IN = 6             # length of the "future chunk sizes" vector
CONV_T = CONV_IN - CONV_K + 1            # 3 output time steps
CNN_F = CONV_T * FE_CNN_UNUM             # 384 flattened conv features
HIDDEN = 128                             # hidden_layers default = [128]
CONCAT_F = CNN_F + FE_LATENT_UNUM + 5 * FE_MLP_UNUM   # 2048
LEAKY_SLOPE = 0.01                       # nn.LeakyReLU default


def _round_up(x, m):
    return (x + m - 1) // m * m


def _leaky(x):
    # Valid because 0 < slope < 1: max(x, slope*x) == LeakyReLU(x). mul+max (2 VALU ops).
    return jnp.maximum(x, LEAKY_SLOPE * x)


def _critic_kernel(x_ref, wbd_ref, bcat_ref, wm_ref, bm_ref, wv_ref, bv_ref,
                   out_ref, concat_ref):
    f32 = jnp.float32
    bf16 = jnp.bfloat16

    # ---- all 7 feature-extractor branches: ONE block-diagonal bf16 matmul ----
    # Column layout of wbd/bcat reproduces torch.cat((cnn, latent, m1, m2, m3,
    # thp, dl), dim=1) exactly; zero rows/cols handle the K padding.
    concat = _leaky(
        jnp.dot(x_ref[...].astype(bf16), wbd_ref[...],
                preferred_element_type=f32)
        + bcat_ref[...])
    concat_ref[...] = concat.astype(bf16)      # lane-dense 2048-wide store

    # ---- hidden MLP: single fused [TB,2048]x[2048,128] bf16 matmul ----------
    h = _leaky(
        jnp.dot(concat_ref[...], wm_ref[...], preferred_element_type=f32)
        + bm_ref[...])

    # ---- value head (N=1): lane reduce on VPU/XLU instead of an MXU matmul --
    out_ref[...] = (jnp.sum(h * wv_ref[...], axis=-1, keepdims=True)
                    + bv_ref[...])


def critic_forward_pallas(states, latent, p, block_b=None):
    """states: [B, C>=11, H] float32, latent: [B, latent_dim] float32."""
    B, _, H = states.shape

    # Slice first (cheap views of states), then build ONE fused branch input;
    # only this small [B, Kb] array is ever padded (no full-tensor HBM copy).
    thp = states[:, 0, :]           # [B, H]  throughput history
    dl = states[:, 10, :]           # [B, H]  download-time history
    scal = states[:, 1:4, -1]       # [B, 3]  buffer / quality / chunk_remain
    fut = states[:, 4:10, -1]       # [B, 6]  future chunk sizes
    x_cat = jnp.concatenate([fut, latent, scal, thp, dl], axis=1)   # [B, Kb]
    kb = x_cat.shape[1]
    kb_pad = p["w_bd"].shape[0]
    if kb_pad != kb:
        x_cat = jnp.pad(x_cat, ((0, 0), (0, kb_pad - kb)))

    if block_b is None:
        if B > 8:
            # Big tiles amortize per-step pipeline overhead; >=2 grid steps so
            # the "parallel" batch axis can feed both v7x TensorCores.
            block_b = min(512, _round_up(B // 2, 8))
        else:
            block_b = _round_up(B, 8)           # f32 sublane-aligned tile
    TB = block_b
    B_pad = _round_up(B, TB)
    if B_pad != B:
        x_cat = jnp.pad(x_cat, ((0, B_pad - B), (0, 0)))

    def resident(arr):              # full block, constant index -> stays in VMEM
        nd = arr.ndim
        return pl.BlockSpec(arr.shape, lambda i, _nd=nd: (0,) * _nd)

    weights = (p["w_bd"], p["b_cat"], p["w_mlp_bf16"], p["bm"],
               p["wv_row"], p["bv"])

    out = pl.pallas_call(
        _critic_kernel,
        out_shape=jax.ShapeDtypeStruct((B_pad, 1), jnp.float32),
        grid=(B_pad // TB,),
        in_specs=[pl.BlockSpec((TB, kb_pad), lambda i: (i, 0))]
                 + [resident(w) for w in weights],
        out_specs=pl.BlockSpec((TB, 1), lambda i: (i, 0)),
        scratch_shapes=[pltpu.VMEM((TB, CONCAT_F), jnp.bfloat16)],
        compiler_params=pltpu.CompilerParams(
            dimension_semantics=("parallel",)),
    )(x_cat, *weights)
    return out[:B]


def init_params(key, latent_dim, his_dim, hidden=HIDDEN):
    """Deterministic synthetic parameters (PyTorch-style uniform fan-in init)."""
    keys = jax.random.split(key, 16)

    def u(k, shape, fan_in):
        b = 1.0 / (fan_in ** 0.5)
        return jax.random.uniform(k, shape, jnp.float32, -b, b)

    p = {}
    # Conv1d(1, 128, 4): torch weight [128, 1, 4] stored transposed as [4, 128]
    p["wconv_t"] = u(keys[0], (CONV_K, FE_CNN_UNUM), CONV_K)
    p["bconv"] = u(keys[1], (1, FE_CNN_UNUM), CONV_K)
    # Toeplitz expansion [6, 128, 3] -> [6, 384]; column index = c*3 + t so one
    # matmul reproduces the channel-major .view(-1, 384) of the conv output.
    toep = jnp.zeros((CONV_IN, FE_CNN_UNUM, CONV_T), jnp.float32)
    for t in range(CONV_T):
        toep = toep.at[t:t + CONV_K, :, t].set(p["wconv_t"])
    wconv_toep = toep.reshape(CONV_IN, CNN_F)
    bconv_rep = jnp.repeat(p["bconv"][0], CONV_T).reshape(1, CNN_F)
    # FeatureExactor_latent: Linear(latent_dim, 1024)
    p["wlat"] = u(keys[2], (latent_dim, FE_LATENT_UNUM), latent_dim)
    p["blat"] = u(keys[3], (1, FE_LATENT_UNUM), latent_dim)
    # FeatureExactor_MLP_{1,2,3}: Linear(1, 128) each, stacked
    p["ws"] = u(keys[4], (3, FE_MLP_UNUM), 1)
    p["bs"] = u(keys[5], (3, FE_MLP_UNUM), 1)
    # FeatureExactor_TD_{1,2}: Linear(his_dim, 128)
    p["wt"] = u(keys[6], (his_dim, FE_MLP_UNUM), his_dim)
    p["bt"] = u(keys[7], (1, FE_MLP_UNUM), his_dim)
    p["wd"] = u(keys[8], (his_dim, FE_MLP_UNUM), his_dim)
    p["bd"] = u(keys[9], (1, FE_MLP_UNUM), his_dim)
    # hidden MLP: Linear(2048, hidden) -- kept whole (concat-fused in kernel)
    p["w_mlp_full"] = u(keys[10], (CONCAT_F, hidden), CONCAT_F)
    p["bm"] = u(keys[11], (1, hidden), CONCAT_F)
    # value head: Linear(hidden, 1); stored as a row for the lane reduce
    p["wv"] = u(keys[12], (hidden, 1), hidden)
    p["wv_row"] = p["wv"].reshape(1, hidden)
    p["bv"] = u(keys[13], (1, 1), hidden)

    # ---- block-diagonal packing of every branch into one [Kb_pad, 2048] -----
    # Row blocks match the wrapper's x_cat = [fut | latent | scal | thp | dl];
    # column blocks match the torch.cat ordering of the concat features.
    kb = CONV_IN + latent_dim + 3 + 2 * his_dim
    kb_pad = _round_up(kb, 16)                  # bf16 sublane packing
    w_bd = jnp.zeros((kb_pad, CONCAT_F), jnp.float32)
    r, c = 0, 0
    w_bd = w_bd.at[r:r + CONV_IN, c:c + CNN_F].set(wconv_toep)
    r += CONV_IN; c += CNN_F
    w_bd = w_bd.at[r:r + latent_dim, c:c + FE_LATENT_UNUM].set(p["wlat"])
    r += latent_dim; c += FE_LATENT_UNUM
    for i in range(3):                          # buffer / quality / chunk
        w_bd = w_bd.at[r, c:c + FE_MLP_UNUM].set(p["ws"][i])
        r += 1; c += FE_MLP_UNUM
    w_bd = w_bd.at[r:r + his_dim, c:c + FE_MLP_UNUM].set(p["wt"])
    r += his_dim; c += FE_MLP_UNUM
    w_bd = w_bd.at[r:r + his_dim, c:c + FE_MLP_UNUM].set(p["wd"])
    b_cat = jnp.concatenate(
        [bconv_rep, p["blat"], p["bs"][0:1], p["bs"][1:2], p["bs"][2:3],
         p["bt"], p["bd"]], axis=1)             # [1, 2048]

    p["w_bd"] = w_bd.astype(jnp.bfloat16)       # bf16 MXU operands, f32 accum
    p["b_cat"] = b_cat
    p["w_mlp_bf16"] = p["w_mlp_full"].astype(jnp.bfloat16)
    p["wconv_toep"] = wconv_toep                # f32 originals for the reference
    p["bconv_rep"] = bconv_rep
    return p


def critic_forward_ref(states, latent, p):
    """Pure-JAX f32 reference reproducing the PyTorch forward exactly."""
    hi = jax.lax.Precision.HIGHEST

    def dot(a, b):
        return jnp.dot(a, b, precision=hi)

    leaky = _leaky
    B = states.shape[0]
    thp = states[:, 0, :]
    dl = states[:, 10, :]
    buf = states[:, 1:2, -1]
    qual = states[:, 2:3, -1]
    chunk = states[:, 3:4, -1]
    fut = states[:, 4:10, -1]                                        # [B, 6]
    conv = jnp.stack([dot(fut[:, t:t + CONV_K], p["wconv_t"]) + p["bconv"]
                      for t in range(CONV_T)], axis=2)               # [B, 128, 3]
    cnn_flat = leaky(conv).reshape(B, -1)                            # channel-major .view
    lat = leaky(dot(latent, p["wlat"]) + p["blat"])
    m1 = leaky(dot(buf, p["ws"][0:1]) + p["bs"][0:1])
    m2 = leaky(dot(qual, p["ws"][1:2]) + p["bs"][1:2])
    m3 = leaky(dot(chunk, p["ws"][2:3]) + p["bs"][2:3])
    tf = leaky(dot(thp, p["wt"]) + p["bt"])
    df = leaky(dot(dl, p["wd"]) + p["bd"])
    hidden_inputs = jnp.concatenate([cnn_flat, lat, m1, m2, m3, tf, df], axis=1)
    h = leaky(dot(hidden_inputs, p["w_mlp_full"]) + p["bm"])
    return dot(h, p["wv"]) + p["bv"]


if __name__ == "__main__":
    B, C, H, LATENT = 2, 11, 8, 16       # batch, state_channels, his_dim, latent_dim
    key = jax.random.PRNGKey(0)
    k_s, k_l, k_p = jax.random.split(key, 3)
    states = jax.random.normal(k_s, (B, C, H), jnp.float32)
    latent = jax.random.normal(k_l, (B, LATENT), jnp.float32)
    params = init_params(k_p, LATENT, H)

    fwd = jax.jit(critic_forward_pallas)
    out = jax.block_until_ready(fwd(states, latent, params))
    ref = critic_forward_ref(states, latent, params)

    assert out.shape == (B, 1), out.shape
    # bf16 MXU operands with f32 accumulation vs f32 reference -> relaxed check.
    assert jnp.allclose(out, ref, rtol=2e-2, atol=2e-2), (out, ref)
    print("KERNEL_OK")
</pallas_src>

<mosaic_0001>
module attributes {stable_mosaic.version = 11 : i64} {
  func.func @_critic_kernel(%arg0: i32, %arg1: memref<8x48xf32, #tpu.memory_space<vmem>>, %arg2: memref<48x2048xbf16, #tpu.memory_space<vmem>>, %arg3: memref<1x2048xf32, #tpu.memory_space<vmem>>, %arg4: memref<2048x128xbf16, #tpu.memory_space<vmem>>, %arg5: memref<1x128xf32, #tpu.memory_space<vmem>>, %arg6: memref<1x128xf32, #tpu.memory_space<vmem>>, %arg7: memref<1x1xf32, #tpu.memory_space<vmem>>, %arg8: memref<8x1xf32, #tpu.memory_space<vmem>>, %arg9: memref<8x2048xbf16, #tpu.memory_space<vmem>>) attributes {dimension_semantics = [#tpu.dimension_semantics<parallel>], iteration_bounds = array<i64: 1>, scalar_prefetch = 0 : i64, scratch_operands = 1 : i64, tpu.core_type = #tpu.core_type<tc>, window_params = [{transform_indices = @transform_0, window_bounds = array<i64: 8, 48>}, {pipeline_mode = #tpu.pipeline_mode<synchronous>, transform_indices = @transform_1, window_bounds = array<i64: 48, 2048>}, {pipeline_mode = #tpu.pipeline_mode<synchronous>, transform_indices = @transform_2, window_bounds = array<i64: 1, 2048>}, {pipeline_mode = #tpu.pipeline_mode<synchronous>, transform_indices = @transform_3, window_bounds = array<i64: 2048, 128>}, {pipeline_mode = #tpu.pipeline_mode<synchronous>, transform_indices = @transform_4, window_bounds = array<i64: 1, 128>}, {pipeline_mode = #tpu.pipeline_mode<synchronous>, transform_indices = @transform_5, window_bounds = array<i64: 1, 128>}, {pipeline_mode = #tpu.pipeline_mode<synchronous>, transform_indices = @transform_6, window_bounds = array<i64: 1, 1>}, {transform_indices = @transform_7, window_bounds = array<i64: 8, 1>}]} {
    %c0 = arith.constant 0 : index
    %c0_0 = arith.constant 0 : index
    %0 = vector.load %arg1[%c0, %c0_0] : memref<8x48xf32, #tpu.memory_space<vmem>>, vector<8x48xf32>
    %1 = arith.truncf %0 : vector<8x48xf32> to vector<8x48xbf16>
    %c0_1 = arith.constant 0 : index
    %c0_2 = arith.constant 0 : index
    %2 = vector.load %arg2[%c0_1, %c0_2] : memref<48x2048xbf16, #tpu.memory_space<vmem>>, vector<48x2048xbf16>
    %cst = arith.constant dense<0.000000e+00> : vector<8x2048xf32>
    %3 = tpu.matmul %1, %2, %cst {dimension_numbers = #tpu.dot_dimension_numbers<[1], [0], [0], [1], [0, 0, 1, 1], [], []>} : vector<8x48xbf16>, vector<48x2048xbf16>, vector<8x2048xf32> -> vector<8x2048xf32>
    %c0_3 = arith.constant 0 : index
    %c0_4 = arith.constant 0 : index
    %4 = vector.load %arg3[%c0_3, %c0_4] : memref<1x2048xf32, #tpu.memory_space<vmem>>, vector<1x2048xf32>
    %5 = vector.broadcast %4 : vector<1x2048xf32> to vector<8x2048xf32>
    %6 = arith.addf %3, %5 : vector<8x2048xf32>
    %cst_5 = arith.constant 0.00999999977 : f32
    %7 = vector.broadcast %cst_5 : f32 to vector<8x2048xf32>
    %8 = arith.mulf %7, %6 : vector<8x2048xf32>
    %9 = arith.maximumf %6, %8 : vector<8x2048xf32>
    %10 = arith.truncf %9 : vector<8x2048xf32> to vector<8x2048xbf16>
    %c0_6 = arith.constant 0 : index
    %c0_7 = arith.constant 0 : index
    %11 = vector.load %arg9[%c0_6, %c0_7] : memref<8x2048xbf16, #tpu.memory_space<vmem>>, vector<8x2048xbf16>
    tpu.vector_store %arg9[%c0_6, %c0_7], %10 {strides = array<i32>} : memref<8x2048xbf16, #tpu.memory_space<vmem>>, vector<8x2048xbf16>,
    %c0_8 = arith.constant 0 : index
    %c0_9 = arith.constant 0 : index
    %12 = vector.load %arg9[%c0_8, %c0_9] : memref<8x2048xbf16, #tpu.memory_space<vmem>>, vector<8x2048xbf16>
    %c0_10 = arith.constant 0 : index
    %c0_11 = arith.constant 0 : index
    %13 = vector.load %arg4[%c0_10, %c0_11] : memref<2048x128xbf16, #tpu.memory_space<vmem>>, vector<2048x128xbf16>
    %cst_12 = arith.constant dense<0.000000e+00> : vector<8x128xf32>
    %14 = tpu.matmul %12, %13, %cst_12 {dimension_numbers = #tpu.dot_dimension_numbers<[1], [0], [0], [1], [0, 0, 1, 1], [], []>} : vector<8x2048xbf16>, vector<2048x128xbf16>, vector<8x128xf32> -> vector<8x128xf32>
    %c0_13 = arith.constant 0 : index
    %c0_14 = arith.constant 0 : index
    %15 = vector.load %arg5[%c0_13, %c0_14] : memref<1x128xf32, #tpu.memory_space<vmem>>, vector<1x128xf32>
    %16 = vector.broadcast %15 : vector<1x128xf32> to vector<8x128xf32>
    %17 = arith.addf %14, %16 : vector<8x128xf32>
    %cst_15 = arith.constant 0.00999999977 : f32
    %18 = vector.broadcast %cst_15 : f32 to vector<8x128xf32>
    %19 = arith.mulf %18, %17 : vector<8x128xf32>
    %20 = arith.maximumf %17, %19 : vector<8x128xf32>
    %c0_16 = arith.constant 0 : index
    %c0_17 = arith.constant 0 : index
    %21 = vector.load %arg6[%c0_16, %c0_17] : memref<1x128xf32, #tpu.memory_space<vmem>>, vector<1x128xf32>
    %22 = vector.broadcast %21 : vector<1x128xf32> to vector<8x128xf32>
    %23 = arith.mulf %20, %22 : vector<8x128xf32>
    %cst_18 = arith.constant dense<0.000000e+00> : vector<8xf32>
    %24 = vector.multi_reduction <add>, %23, %cst_18 [1] : vector<8x128xf32> to vector<8xf32>
    %25 = vector.shape_cast %24 : vector<8xf32> to vector<8x1xf32>
    %c0_19 = arith.constant 0 : index
    %c0_20 = arith.constant 0 : index
    %26 = vector.load %arg7[%c0_19, %c0_20] : memref<1x1xf32, #tpu.memory_space<vmem>>, vector<1x1xf32>
    %27 = vector.broadcast %26 : vector<1x1xf32> to vector<8x1xf32>
    %28 = arith.addf %25, %27 : vector<8x1xf32>
    %c0_21 = arith.constant 0 : index
    %c0_22 = arith.constant 0 : index
    %29 = vector.load %arg8[%c0_21, %c0_22] : memref<8x1xf32, #tpu.memory_space<vmem>>, vector<8x1xf32>
    tpu.vector_store %arg8[%c0_21, %c0_22], %28 {strides = array<i32>} : memref<8x1xf32, #tpu.memory_space<vmem>>, vector<8x1xf32>,
    return
  }
  func.func @transform_0(%arg0: i32) -> (i32, i32) {
    %c0_i32 = arith.constant 0 : i32
    %c0_i32_0 = arith.constant 0 : i32
    return %arg0, %c0_i32 : i32, i32
  }
  func.func @transform_1(%arg0: i32) -> (i32, i32) {
    %c0_i32 = arith.constant 0 : i32
    %c0_i32_0 = arith.constant 0 : i32
    %c0_i32_1 = arith.constant 0 : i32
    return %c0_i32, %c0_i32_0 : i32, i32
  }
  func.func @transform_2(%arg0: i32) -> (i32, i32) {
    %c0_i32 = arith.constant 0 : i32
    %c0_i32_0 = arith.constant 0 : i32
    %c0_i32_1 = arith.constant 0 : i32
    return %c0_i32, %c0_i32_0 : i32, i32
  }
  func.func @transform_3(%arg0: i32) -> (i32, i32) {
    %c0_i32 = arith.constant 0 : i32
    %c0_i32_0 = arith.constant 0 : i32
    %c0_i32_1 = arith.constant 0 : i32
    return %c0_i32, %c0_i32_0 : i32, i32
  }
  func.func @transform_4(%arg0: i32) -> (i32, i32) {
    %c0_i32 = arith.constant 0 : i32
    %c0_i32_0 = arith.constant 0 : i32
    %c0_i32_1 = arith.constant 0 : i32
    return %c0_i32, %c0_i32_0 : i32, i32
  }
  func.func @transform_5(%arg0: i32) -> (i32, i32) {
    %c0_i32 = arith.constant 0 : i32
    %c0_i32_0 = arith.constant 0 : i32
    %c0_i32_1 = arith.constant 0 : i32
    return %c0_i32, %c0_i32_0 : i32, i32
  }
  func.func @transform_6(%arg0: i32) -> (i32, i32) {
    %c0_i32 = arith.constant 0 : i32
    %c0_i32_0 = arith.constant 0 : i32
    %c0_i32_1 = arith.constant 0 : i32
    return %c0_i32, %c0_i32_0 : i32, i32
  }
  func.func @transform_7(%arg0: i32) -> (i32, i32) {
    %c0_i32 = arith.constant 0 : i32
    %c0_i32_0 = arith.constant 0 : i32
    return %arg0, %c0_i32 : i32, i32
  }
}

</mosaic_0001>

<bundles_post_ra>
// kernel: critic_forward_pallas.1
= control target key start
LH: loop header
LB: loop body
LE: loop exit
PB: predicated region body
PF: predicated region fallthrough
CT: control target
= control target key end

     0   :  { %s3099_s0 = inlined_call_operand.vmem [shape: f32[8,48], index: 0, kind: input, shape index: {}]   ;;  %s3100_s1 = inlined_call_operand.hbm [shape: bf16[48,2048], index: 1, kind: input, shape index: {}]   ;;  %s3101_s2 = inlined_call_operand.vmem [shape: f32[1,2048], index: 2, kind: input, shape index: {}]   ;;  %s3102_s3 = inlined_call_operand.hbm [shape: bf16[2048,128], index: 3, kind: input, shape index: {}]   ;;  %s3103_s4 = inlined_call_operand.vmem [shape: f32[1,128], index: 4, kind: input, shape index: {}]   ;;  %s3104_s5 = inlined_call_operand.vmem [shape: f32[1,128], index: 5, kind: input, shape index: {}]   ;;  %s3105_s6 = inlined_call_operand.<no memory space> [shape: f32[1,1], index: 6, kind: input, shape index: {}]   ;;  %s3106_s7 = inlined_call_operand.vmem [shape: f32[8,1], index: 7, kind: output, shape index: {}]  }
   0x1   :  { %v12_v0 = vstv %s3105_s6 }
   0x2   :  { %13 = vst [vmem:[#allocation3] sm:$0x1] %v12_v0 }
   0x3   :  { %14 = vsyncpa [#allocation5], 0 }
   0x4   :  { %15 = vsyncpa [#allocation7], 0  ;;  %s2903_s26 = smov [#allocation4]   ;;  %s2855_s30 = scalar_lea.hbm %s3100_s1, 6144 }
   0x5   :  { %s23_s27 = sshll.u32 %s2903_s26, 4  ;;  %p2856_p0 = scmp.ne.s32.totalorder %s3100_s1, %s2855_s30  ;;  %s24_s27 = int_to_ptr.vmem [resolvable:$true] %s23_s27 }
   0x6   :  { %p2859_p1 = scmp.lt.u32.totalorder %s2855_s30, %s3100_s1 }
   0x8   :  { %p2861_p2 = pnand %p2859_p1, %p2856_p0 }
   0xa   :  { %2864 = shalt.err (!%p2861_p2)
}
   0xb   :  { %s2865_s6 = scalar_lea.vmem %s24_s27, 6144  ;;  %p2870_p4 = scmp.lt.s32.totalorder %s24_s27, %s24_s27 }
   0xc   :  { %p2866_p3 = scmp.ne.s32.totalorder %s24_s27, %s2865_s6  ;;  %p2871_p5 = scmp.lt.s32.totalorder %s2865_s6, %s2865_s6 }
   0xe   :  { %p2872_p6 = por %p2871_p5, %p2870_p4 }
  0x10   :  { %p2873_p7 = pnand %p2872_p6, %p2866_p3 }
  0x12   :  { %2876 = shalt.err (!%p2873_p7)
}
  0x13   :  { %s2904_s12 = smov 1024   ;;  %s2905_s13 = smov 64  }
  0x14   :  { %29 = dma.hbm_to_vmem [thread:$0]  %s3100_s1, 6144, %s24_s27, [#allocation5], %s2904_s12, %s2904_s12, %s2905_s13  }
  0x15   :  { %s2906_s16 = smov [#allocation6]   ;;  %s2877_s20 = scalar_lea.hbm %s3102_s3, 16384 }
  0x16   :  { %s37_s17 = sshll.u32 %s2906_s16, 4  ;;  %p2878_p8 = scmp.ne.s32.totalorder %s3102_s3, %s2877_s20  ;;  %s38_s17 = int_to_ptr.vmem [resolvable:$true] %s37_s17 }
  0x17   :  { %p2881_p9 = scmp.lt.u32.totalorder %s2877_s20, %s3102_s3 }
  0x19   :  { %p2883_p10 = pnand %p2881_p9, %p2878_p8 }
  0x1b   :  { %2886 = shalt.err (!%p2883_p10)
}
  0x1c   :  { %s2887_s25 = scalar_lea.vmem %s38_s17, 16384  ;;  %p2892_p12 = scmp.lt.s32.totalorder %s38_s17, %s38_s17 }
  0x1d   :  { %p2888_p11 = scmp.ne.s32.totalorder %s38_s17, %s2887_s25  ;;  %p2893_p13 = scmp.lt.s32.totalorder %s2887_s25, %s2887_s25 }
  0x1f   :  { %p2894_p0 = por %p2893_p13, %p2892_p12 }
  0x21   :  { %p2895_p1 = pnand %p2894_p0, %p2888_p11 }
  0x23   :  { %2898 = shalt.err (!%p2895_p1)
}
  0x24   :  { %s2907_s1 = smov 4  }
  0x25   :  { %43 = dma.hbm_to_vmem [thread:$0]  %s3102_s3, 16384, %s38_s17, [#allocation7], %s2905_s13, %s2905_s13, %s2907_s1  }
  0x26   :  { %2899 = dma.done.wait [#allocation5], 6144  }
  0x27   :  { %2900 = vsyncadd [#allocation5], 4294961152 }
  0x28   :  { %2901 = dma.done.wait [#allocation7], 16384  }
  0x29   :  { %2902 = vsyncadd [#allocation7], 4294950912  ;;  %v2908_v1 = vmov 0   ;;  %v59_v2 = vld [vmem:[#allocation4] sm:$0xff]  ;;  %v60_v4 = vld [vmem:[#allocation4 + $0x8] sm:$0xff]  ;;  %vm431_vm0 = vcmask 392192  }
  0x2a   :  { %467 = vmatprep.mubr.bf16.mxu0 %v2908_v1  ;;  %508 = vmatprep.mubr.bf16.mxu1 %v2908_v1  ;;  %v67_v3 = vld [vmem:[#allocation4 + $0x40] sm:$0xff]  ;;  %v68_v6 = vld [vmem:[#allocation4 + $0x48] sm:$0xff]  ;;  %v61_v24 = vld [vmem:[#allocation4 + $0x10] sm:$0xff]  ;;  %vm2302_vm1 = vcmask 7168  }
  0x2b   :  { %v2311_v5 = vcombine.high %v59_v2, %v67_v3  ;;  %v2310_v7 = vcombine.low %v59_v2, %v67_v3  ;;  %v75_v8 = vld [vmem:[#allocation4 + $0x80] sm:$0xff]  ;;  %v2313_v10 = vcombine.high %v60_v4, %v68_v6  ;;  %v2312_v11 = vcombine.low %v60_v4, %v68_v6  ;;  %v76_v13 = vld [vmem:[#allocation4 + $0x88] sm:$0xff]  ;;  %v69_v25 = vld [vmem:[#allocation4 + $0x50] sm:$0xff] }
  0x2c   :  { %v83_v9 = vld [vmem:[#allocation4 + $0xc0] sm:$0xff]  ;;  %v84_v14 = vld [vmem:[#allocation4 + $0xc8] sm:$0xff]  ;;  %v62_v26 = vld [vmem:[#allocation4 + $0x18] sm:$0xff]  ;;  %v2315_v31 = vcombine.high %v61_v24, %v69_v25  ;;  %v2314_v38 = vcombine.low %v61_v24, %v69_v25 }
  0x2d   :  { %v2327_v12 = vcombine.high %v75_v8, %v83_v9  ;;  %v91_v15 = vld [vmem:[#allocation4 + $0x100] sm:$0xff]  ;;  %435 = vmatprep.subr.bf16.mxu0 %v2311_v5  ;;  %v2329_v16 = vcombine.high %v76_v13, %v84_v14  ;;  %v92_v18 = vld [vmem:[#allocation4 + $0x108] sm:$0xff]  ;;  %476 = vmatprep.subr.bf16.mxu1 %v2313_v10  ;;  %v2326_v20 = vcombine.low %v75_v8, %v83_v9  ;;  %v70_v27 = vld [vmem:[#allocation4 + $0x58] sm:$0xff] }
  0x2e   :  { %v99_v17 = vld [vmem:[#allocation4 + $0x140] sm:$0xff]  ;;  %v100_v19 = vld [vmem:[#allocation4 + $0x148] sm:$0xff]  ;;  %436 = vmatpush1.bf16.msra.mxu0 %v2310_v7  ;;  %477 = vmatpush1.bf16.msra.mxu1 %v2312_v11  ;;  %v2328_v21 = vcombine.low %v76_v13, %v84_v14  ;;  %v2317_v32 = vcombine.high %v62_v26, %v70_v27  ;;  %v77_v33 = vld [vmem:[#allocation4 + $0x90] sm:$0xff]  ;;  %v2316_v39 = vcombine.low %v62_v26, %v70_v27 }
  0x2f   :  { %437 = vmatprep.subr.bf16.mxu0 %v2327_v12  ;;  %v2343_v22 = vcombine.high %v91_v15, %v99_v17  ;;  %478 = vmatprep.subr.bf16.mxu1 %v2329_v16  ;;  %v2345_v23 = vcombine.high %v92_v18, %v100_v19  ;;  %v2342_v28 = vcombine.low %v91_v15, %v99_v17  ;;  %v57_v29 = vld [vmem:[%s3099_s0] sm:$0xff]  ;;  %v85_v34 = vld [vmem:[#allocation4 + $0xd0] sm:$0xff]  ;;  %v64_v52 = vld [vmem:[#allocation4 + $0x28] sm:$0xff] }
  0x30   :  { %v2344_v30 = vcombine.low %v92_v18, %v100_v19  ;;  %v2981_v35 = vpack.c.bf16 %v57_v29, %v57_v29  ;;  %v78_v36 = vld [vmem:[#allocation4 + $0x98] sm:$0xff]  ;;  %v2331_v40 = vcombine.high %v77_v33, %v85_v34  ;;  %v93_v42 = vld [vmem:[#allocation4 + $0x110] sm:$0xff]  ;;  %v2330_v46 = vcombine.low %v77_v33, %v85_v34  ;;  %v63_v47 = vld [vmem:[#allocation4 + $0x20] sm:$0xff] }
  0x31   :  { %v86_v37 = vld [vmem:[#allocation4 + $0xd8] sm:$0xff]  ;;  %v101_v43 = vld [vmem:[#allocation4 + $0x150] sm:$0xff]  ;;  %v71_v50 = vld [vmem:[#allocation4 + $0x60] sm:$0xff] }
  0x32   :  { %438 = vmatpush1.bf16.msra.mxu0 %v2326_v20  ;;  %479 = vmatpush1.bf16.msra.mxu1 %v2328_v21  ;;  %v2333_v41 = vcombine.high %v78_v36, %v86_v37  ;;  %v94_v44 = vld [vmem:[#allocation4 + $0x118] sm:$0xff]  ;;  %v2332_v48 = vcombine.low %v78_v36, %v86_v37  ;;  %v2347_v49 = vcombine.high %v93_v42, %v101_v43  ;;  %v72_v53 = vld [vmem:[#allocation4 + $0x68] sm:$0xff]  ;;  %v79_v55 = vld [vmem:[#allocation4 + $0xa0] sm:$0xff] }
  0x33   :  { %439 = vmatprep.subr.bf16.mxu0 %v2343_v22  ;;  %480 = vmatprep.subr.bf16.mxu1 %v2345_v23  ;;  %v102_v45 = vld [vmem:[#allocation4 + $0x158] sm:$0xff]  ;;  %v2346_v54 = vcombine.low %v93_v42, %v101_v43  ;;  %v2319_v57 = vcombine.high %v63_v47, %v71_v50  ;;  %v87_v58 = vld [vmem:[#allocation4 + $0xe0] sm:$0xff]  ;;  %v2321_v59 = vcombine.high %v64_v52, %v72_v53  ;;  %v80_v60 = vld [vmem:[#allocation4 + $0xa8] sm:$0xff] }
  0x34   :  { %v2349_v51 = vcombine.high %v94_v44, %v102_v45  ;;  %v2348_v56 = vcombine.low %v94_v44, %v102_v45  ;;  %v88_v61 = vld [vmem:[#allocation4 + $0xe8] sm:$0xff]  ;;  %v2318_v62 = vcombine.low %v63_v47, %v71_v50  ;;  %v95_v63 = vld [vmem:[#allocation4 + $0x120] sm:$0xff]  ;;  %v2320_v0 = vcombine.low %v64_v52, %v72_v53  ;;  %v65_v8 = vld [vmem:[#allocation4 + $0x30] sm:$0xff] }
  0x35   :  { %v2335_v2 = vcombine.high %v79_v55, %v87_v58  ;;  %v103_v3 = vld [vmem:[#allocation4 + $0x160] sm:$0xff]  ;;  %v2337_v4 = vcombine.high %v80_v60, %v88_v61  ;;  %v96_v5 = vld [vmem:[#allocation4 + $0x128] sm:$0xff]  ;;  %v2334_v7 = vcombine.low %v79_v55, %v87_v58  ;;  %v2336_v9 = vcombine.low %v80_v60, %v88_v61  ;;  %v73_v11 = vld [vmem:[#allocation4 + $0x70] sm:$0xff] }
  0x36   :  { %440 = vmatpush1.bf16.msra.mxu0 %v2342_v28  ;;  %481 = vmatpush1.bf16.msra.mxu1 %v2344_v30  ;;  %v104_v6 = vld [vmem:[#allocation4 + $0x168] sm:$0xff]  ;;  %v2351_v10 = vcombine.high %v95_v63, %v103_v3  ;;  %v66_v13 = vld [vmem:[#allocation4 + $0x38] sm:$0xff]  ;;  %v2350_v15 = vcombine.low %v95_v63, %v103_v3  ;;  %v81_v16 = vld [vmem:[#allocation4 + $0xb0] sm:$0xff]  ;;  %v2323_v18 = vcombine.high %v65_v8, %v73_v11 }
  0x37   :  { %517 = vmatprep.subr.bf16.mxu0 %v2315_v31  ;;  %558 = vmatprep.subr.bf16.mxu1 %v2317_v32  ;;  %v2353_v12 = vcombine.high %v96_v5, %v104_v6  ;;  %v74_v14 = vld [vmem:[#allocation4 + $0x78] sm:$0xff]  ;;  %v2352_v17 = vcombine.low %v96_v5, %v104_v6  ;;  %v89_v19 = vld [vmem:[#allocation4 + $0xf0] sm:$0xff]  ;;  %v2322_v23 = vcombine.low %v65_v8, %v73_v11  ;;  %v2727_v36 = vld [vmem:[#allocation6 + $0x40] sm:$0xff]  }
  0x38   :  { %v2325_v20 = vcombine.high %v66_v13, %v74_v14  ;;  %v82_v21 = vld [vmem:[#allocation4 + $0xb8] sm:$0xff]  ;;  %v97_v24 = vld [vmem:[#allocation4 + $0x130] sm:$0xff]  ;;  %v2324_v25 = vcombine.low %v66_v13, %v74_v14  ;;  %v2339_v26 = vcombine.high %v81_v16, %v89_v19  ;;  %v2338_v31 = vcombine.low %v81_v16, %v89_v19  ;;  %v2731_v42 = vld [vmem:[#allocation6 + $0x48] sm:$0xff]  }
  0x39   :  { %2358 = vmatmul.mubr.msk.bf16.vlgmr.msra.gmra.mrb[0].mxu0 %vm431_vm0, %v2981_v35  ;;  %2359 = vmatmul.mubr.msk.bf16.vlgmr.msra.gmra.mrb[0].mxu1 %vm431_vm0, %v2981_v35  ;;  %v90_v22 = vld [vmem:[#allocation4 + $0xf8] sm:$0xff]  ;;  %v105_v27 = vld [vmem:[#allocation4 + $0x170] sm:$0xff]  ;;  %v2732_v43 = vld [vmem:[#allocation6 + $0xc8] sm:$0xff]  }
  0x3a   :  { %518 = vmatpush1.bf16.msra.mxu0 %v2314_v38  ;;  %559 = vmatpush1.bf16.msra.mxu1 %v2316_v39  ;;  %v2341_v28 = vcombine.high %v82_v21, %v90_v22  ;;  %v98_v29 = vld [vmem:[#allocation4 + $0x138] sm:$0xff]  ;;  %v2340_v32 = vcombine.low %v82_v21, %v90_v22  ;;  %v2355_v33 = vcombine.high %v97_v24, %v105_v27  ;;  %v2728_v38 = vld [vmem:[#allocation6 + $0xc0] sm:$0xff]   ;;  %v2733_v44 = vld [vmem:[#allocation6 + $0x8] sm:$0xff]  }
  0x3b   :  { %519 = vmatprep.subr.bf16.mxu0 %v2331_v40  ;;  %560 = vmatprep.subr.bf16.mxu1 %v2333_v41  ;;  %v106_v30 = vld [vmem:[#allocation4 + $0x178] sm:$0xff]  ;;  %v2354_v37 = vcombine.low %v97_v24, %v105_v27  ;;  %v2729_v40 = vld [vmem:[#allocation6] sm:$0xff]   ;;  %v2735_v45 = vld [vmem:[#allocation6 + $0x50] sm:$0xff]  }
  0x3c   :  { %549 = vmatprep.mubr.bf16.mxu0 %v2908_v1  ;;  %590 = vmatprep.mubr.bf16.mxu1 %v2908_v1  ;;  %v2357_v34 = vcombine.high %v98_v29, %v106_v30  ;;  %v2356_v39 = vcombine.low %v98_v29, %v106_v30  ;;  %v2730_v41 = vld [vmem:[#allocation6 + $0x80] sm:$0xff]   ;;  %v2737_v47 = vld [vmem:[#allocation6 + $0x10] sm:$0xff]   ;;  %v2740_v50 = vld [vmem:[#allocation6 + $0xd8] sm:$0xff]  }
  0x3d   :  { %v2742_v52 = vld [vmem:[#allocation6 + $0x98] sm:$0xff]   ;;  %v2743_v53 = vld [vmem:[#allocation6 + $0x60] sm:$0xff]   ;;  %v2749_v58 = vld [vmem:[#allocation6 + $0x28] sm:$0xff]  }
  0x3e   :  { %520 = vmatpush1.bf16.msra.mxu0 %v2330_v46  ;;  %561 = vmatpush1.bf16.msra.mxu1 %v2332_v48  ;;  %v2736_v46 = vld [vmem:[#allocation6 + $0xd0] sm:$0xff]   ;;  %v2746_v55 = vld [vmem:[#allocation6 + $0xa0] sm:$0xff]   ;;  %v2757_v3 = vld [vmem:[#allocation6 + $0x38] sm:$0xff]  }
  0x3f   :  { %521 = vmatprep.subr.bf16.mxu0 %v2347_v49  ;;  %562 = vmatprep.subr.bf16.mxu1 %v2349_v51  ;;  %v2738_v48 = vld [vmem:[#allocation6 + $0x90] sm:$0xff]   ;;  %v2739_v49 = vld [vmem:[#allocation6 + $0x58] sm:$0xff]   ;;  %v2759_v5 = vld [vmem:[#allocation6 + $0x140] sm:$0xff]  }
  0x40   :  { %v2741_v51 = vld [vmem:[#allocation6 + $0x18] sm:$0xff]   ;;  %v2751_v60 = vld [vmem:[#allocation6 + $0x70] sm:$0xff]   ;;  %v2760_v6 = vld [vmem:[#allocation6 + $0x1c0] sm:$0xff]  }
  0x41   :  { %v2752_v61 = vld [vmem:[#allocation6 + $0xf0] sm:$0xff]  }
  0x42   :  { %522 = vmatpush1.bf16.msra.mxu0 %v2346_v54  ;;  %563 = vmatpush1.bf16.msra.mxu1 %v2348_v56  ;;  %v2744_v54 = vld [vmem:[#allocation6 + $0xe0] sm:$0xff]   ;;  %v2747_v56 = vld [vmem:[#allocation6 + $0x68] sm:$0xff]   ;;  %v2754_v63 = vld [vmem:[#allocation6 + $0xb0] sm:$0xff]  }
  0x43   :  { %599 = vmatprep.subr.bf16.mxu0 %v2319_v57  ;;  %640 = vmatprep.subr.bf16.mxu1 %v2321_v59  ;;  %v2748_v57 = vld [vmem:[#allocation6 + $0xe8] sm:$0xff]  }
  0x44   :  { %v2750_v59 = vld [vmem:[#allocation6 + $0xa8] sm:$0xff]  }
  0x45   :  { %2360 = vmatmul.mubr.msk.bf16.vlgmr.msra.gmra.mrb[4].mxu0 %vm431_vm0, %v2981_v35  ;;  %2361 = vmatmul.mubr.msk.bf16.vlgmr.msra.gmra.mrb[4].mxu1 %vm431_vm0, %v2981_v35 }
  0x46   :  { %600 = vmatpush1.bf16.msra.mxu0 %v2318_v62  ;;  %641 = vmatpush1.bf16.msra.mxu1 %v2320_v0  ;;  %v2753_v62 = vld [vmem:[#allocation6 + $0x30] sm:$0xff]   ;;  %v2755_v0 = vld [vmem:[#allocation6 + $0x78] sm:$0xff]  }
  0x47   :  { %601 = vmatprep.subr.bf16.mxu0 %v2335_v2  ;;  %642 = vmatprep.subr.bf16.mxu1 %v2337_v4  ;;  %v2756_v2 = vld [vmem:[#allocation6 + $0xf8] sm:$0xff]  }
  0x48   :  { %631 = vmatprep.mubr.bf16.mxu0 %v2908_v1  ;;  %672 = vmatprep.mubr.bf16.mxu1 %v2908_v1  ;;  %v2758_v4 = vld [vmem:[#allocation6 + $0xb8] sm:$0xff]  }
  0x4a   :  { %602 = vmatpush1.bf16.msra.mxu0 %v2334_v7  ;;  %643 = vmatpush1.bf16.msra.mxu1 %v2336_v9  ;;  %v111_v7 = vlaneseq }
  0x4b   :  { %603 = vmatprep.subr.bf16.mxu0 %v2351_v10  ;;  %644 = vmatprep.subr.bf16.mxu1 %v2353_v12  ;;  %v3011_v10 = vld [vmem:[%s3101_s2] sm:$0xff] }
  0x4c   :  { %v3005_v8 = vshrl.u32 %v111_v7, 7  ;;  %v3041_v7 = vld [vmem:[%s3101_s2 + $0x8] sm:$0xff] }
  0x4e   :  { %604 = vmatpush1.bf16.msra.mxu0 %v2350_v15  ;;  %645 = vmatpush1.bf16.msra.mxu1 %v2352_v17  ;;  %v113_v9 = vsub.s32 0, %v3005_v8  ;;  %v121_v11 = vsub.s32 2, %v3005_v8  ;;  %v117_v12 = vsub.s32 1, %v3005_v8  ;;  %v125_v13 = vsub.s32 3, %v3005_v8 }
  0x4f   :  { %681 = vmatprep.subr.bf16.mxu0 %v2323_v18  ;;  %722 = vmatprep.subr.bf16.mxu1 %v2325_v20 }
  0x50   :  { %v114_v14 = vrot.slane %v3011_v10, %v113_v9  ;;  %v122_v15 = vrot.slane %v3011_v10, %v121_v11  ;;  %v118_v16 = vrot.slane %v3011_v10, %v117_v12  ;;  %v126_v17 = vrot.slane %v3011_v10, %v125_v13 }
  0x51   :  { %2362 = vmatmul.mubr.msk.bf16.vlgmr.msra.gmra.mrb[8].mxu0 %vm431_vm0, %v2981_v35  ;;  %2363 = vmatmul.mubr.msk.bf16.vlgmr.msra.gmra.mrb[8].mxu1 %vm431_vm0, %v2981_v35 }
  0x52   :  { %682 = vmatpush1.bf16.msra.mxu0 %v2322_v23  ;;  %723 = vmatpush1.bf16.msra.mxu1 %v2324_v25 }
  0x53   :  { %683 = vmatprep.subr.bf16.mxu0 %v2339_v26  ;;  %724 = vmatprep.subr.bf16.mxu1 %v2341_v28 }
  0x54   :  { %713 = vmatprep.mubr.bf16.mxu0 %v2908_v1  ;;  %754 = vmatprep.mubr.bf16.mxu1 %v2908_v1  ;;  %v2734_v1 = vld [vmem:[#allocation6 + $0x88] sm:$0xff]  }
  0x56   :  { %684 = vmatpush1.bf16.msra.mxu0 %v2338_v31  ;;  %725 = vmatpush1.bf16.msra.mxu1 %v2340_v32 }
  0x57   :  { %685 = vmatprep.subr.bf16.mxu0 %v2355_v33  ;;  %726 = vmatprep.subr.bf16.mxu1 %v2357_v34 }
  0x5a   :  { %686 = vmatpush1.bf16.msra.mxu0 %v2354_v37  ;;  %727 = vmatpush1.bf16.msra.mxu1 %v2356_v39 }
  0x5b   :  { %2545 = vmatprep.subr.bf16.mxu0 %v2727_v36  ;;  %2567 = vmatprep.subr.bf16.mxu1 %v2728_v38  ;;  %v133_v38 = vsub.s32 5, %v3005_v8 }
  0x5d   :  { %2364 = vmatmul.mubr.msk.bf16.vlgmr.msra.gmra.mrb[12].mxu0 %vm431_vm0, %v2981_v35  ;;  %2365 = vmatmul.mubr.msk.bf16.vlgmr.msra.gmra.mrb[12].mxu1 %vm431_vm0, %v2981_v35  ;;  %v2745_v35 = vld [vmem:[#allocation6 + $0x20] sm:$0xff]  }
  0x5e   :  { %2546 = vmatpush3.bf16.msra.mxu0 %v2729_v40  ;;  %2568 = vmatpush3.bf16.msra.mxu1 %v2730_v41  ;;  %v141_v40 = vsub.s32 7, %v3005_v8 }
  0x5f   :  { %2547 = vmatprep.subr.bf16.mxu0 %v2731_v42  ;;  %2569 = vmatprep.subr.bf16.mxu1 %v2732_v43  ;;  %v2761_v42 = vld [vmem:[#allocation6 + $0x100] sm:$0xff]  }
  0x62   :  { %2548 = vmatpush3.bf16.msra.mxu0 %v2733_v44  ;;  %2570 = vmatpush3.bf16.msra.mxu1 %v2734_v1  ;;  %v2762_v1 = vld [vmem:[#allocation6 + $0x180] sm:$0xff]  }
  0x63   :  { %2549 = vmatprep.subr.bf16.mxu0 %v2735_v45  ;;  %2571 = vmatprep.subr.bf16.mxu1 %v2736_v46  ;;  %v2763_v45 = vld [vmem:[#allocation6 + $0x148] sm:$0xff]  }
  0x66   :  { %2550 = vmatpush3.bf16.msra.mxu0 %v2737_v47  ;;  %2572 = vmatpush3.bf16.msra.mxu1 %v2738_v48  ;;  %v2764_v47 = vld [vmem:[#allocation6 + $0x1c8] sm:$0xff]   ;;  %v134_v48 = vrot.slane %v3011_v10, %v133_v38 }
  0x67   :  { %2551 = vmatprep.subr.bf16.mxu0 %v2739_v49  ;;  %2573 = vmatprep.subr.bf16.mxu1 %v2740_v50  ;;  %v142_v49 = vrot.slane %v3011_v10, %v141_v40  ;;  %v2765_v50 = vld [vmem:[#allocation6 + $0x108] sm:$0xff]  }
  0x6a   :  { %2552 = vmatpush3.bf16.msra.mxu0 %v2741_v51  ;;  %2574 = vmatpush3.bf16.msra.mxu1 %v2742_v52  ;;  %v2766_v52 = vld [vmem:[#allocation6 + $0x188] sm:$0xff]  }
  0x6b   :  { %2553 = vmatprep.subr.bf16.mxu0 %v2743_v53  ;;  %2575 = vmatprep.subr.bf16.mxu1 %v2744_v54  ;;  %v2767_v53 = vld [vmem:[#allocation6 + $0x150] sm:$0xff]  }
  0x6e   :  { %2554 = vmatpush3.bf16.msra.mxu0 %v2745_v35  ;;  %2576 = vmatpush3.bf16.msra.mxu1 %v2746_v55  ;;  %v2768_v55 = vld [vmem:[#allocation6 + $0x1d0] sm:$0xff]  }
  0x6f   :  { %2555 = vmatprep.subr.bf16.mxu0 %v2747_v56  ;;  %2577 = vmatprep.subr.bf16.mxu1 %v2748_v57 }
  0x72   :  { %2556 = vmatpush3.bf16.msra.mxu0 %v2749_v58  ;;  %2578 = vmatpush3.bf16.msra.mxu1 %v2750_v59 }
  0x73   :  { %2557 = vmatprep.subr.bf16.mxu0 %v2751_v60  ;;  %2579 = vmatprep.subr.bf16.mxu1 %v2752_v61 }
  0x76   :  { %2558 = vmatpush3.bf16.msra.mxu0 %v2753_v62  ;;  %2580 = vmatpush3.bf16.msra.mxu1 %v2754_v63  ;;  %v2769_v62 = vld [vmem:[#allocation6 + $0x110] sm:$0xff]  }
  0x77   :  { %2559 = vmatprep.subr.bf16.mxu0 %v2755_v0  ;;  %2581 = vmatprep.subr.bf16.mxu1 %v2756_v2  ;;  %v2770_v2 = vld [vmem:[#allocation6 + $0x190] sm:$0xff]  }
  0x7a   :  { %2560 = vmatpush3.bf16.msra.mxu0 %v2757_v3  ;;  %2582 = vmatpush3.bf16.msra.mxu1 %v2758_v4  ;;  %v2771_v3 = vld [vmem:[#allocation6 + $0x158] sm:$0xff]  }
  0x7b   :  { %2589 = vmatprep.subr.bf16.mxu0 %v2759_v5  ;;  %2611 = vmatprep.subr.bf16.mxu1 %v2760_v6  ;;  %v2772_v5 = vld [vmem:[#allocation6 + $0x1d8] sm:$0xff]  }
 0x10c   :  { %v469_v18 = vpop.f32.mrb[0].mxu0  ;;  %v510_v20 = vpop.f32.mrb[0].mxu1 }
 0x10d   :  { %v470_v19 = vadd.f32 %v469_v18, %v114_v14  ;;  %v471_v21 = vpop.f32.mrb[1].mxu0  ;;  %v511_v22 = vadd.f32 %v510_v20, %v122_v15  ;;  %v512_v24 = vpop.f32.mrb[1].mxu1  ;;  %v2773_v15 = vld [vmem:[#allocation6 + $0x118] sm:$0xff]   ;;  %v129_v20 = vsub.s32 4, %v3005_v8 }
 0x10e   :  { %v472_v23 = vadd.f32 %v471_v21, %v118_v16  ;;  %v473_v25 = vpop.f32.mrb[2].mxu0  ;;  %v513_v27 = vadd.f32 %v512_v24, %v126_v17  ;;  %v514_v28 = vpop.f32.mrb[2].mxu1  ;;  %v137_v17 = vsub.s32 6, %v3005_v8  ;;  %v2774_v18 = vld [vmem:[#allocation6 + $0x198] sm:$0xff]   ;;  %v154_v24 = vrot.slane %v3041_v7, %v121_v11 }
 0x10f   :  { %v763_v26 = vmul.f32 0.01, %v470_v19  ;;  %v474_v29 = vpop.f32.mrb[3].mxu0  ;;  %v765_v30 = vmul.f32 0.01, %v511_v22  ;;  %v515_v32 = vpop.f32.mrb[3].mxu1  ;;  %v150_v11 = vrot.slane %v3041_v7, %v117_v12 }
 0x110   :  { %v764_v31 = vmul.f32 0.01, %v472_v23  ;;  %v766_v34 = vmul.f32 0.01, %v513_v27  ;;  %v2777_v25 = vld [vmem:[#allocation6 + $0x120] sm:$0xff]   ;;  %v130_v29 = vrot.slane %v3011_v10, %v129_v20  ;;  %v2783_v12 = vld [vmem:[#allocation6 + $0x170] sm:$0xff]  }
 0x111   :  { %v779_v33 = vmax.f32 %v470_v19, %v763_v26  ;;  %v781_v36 = vmax.f32 %v511_v22, %v765_v30  ;;  %v2775_v19 = vld [vmem:[#allocation6 + $0x160] sm:$0xff]   ;;  %v146_v22 = vrot.slane %v3041_v7, %v113_v9  ;;  %v138_v26 = vrot.slane %v3011_v10, %v137_v17  ;;  %v2779_v30 = vld [vmem:[#allocation6 + $0x168] sm:$0xff]  }
 0x112   :  { %v780_v37 = vmax.f32 %v472_v23, %v764_v31  ;;  %v782_v39 = vmax.f32 %v513_v27, %v766_v34  ;;  %v2776_v23 = vld [vmem:[#allocation6 + $0x1e0] sm:$0xff]   ;;  %v158_v10 = vrot.slane %v3041_v7, %v125_v13  ;;  %v2786_v13 = vld [vmem:[#allocation6 + $0x1b0] sm:$0xff]  }
 0x113   :  { %v2529_v43 = vpack.c.bf16 %v779_v33, %v779_v33  ;;  %v2531_v46 = vpack.c.bf16 %v781_v36, %v781_v36  ;;  %v2778_v28 = vld [vmem:[#allocation6 + $0x1a0] sm:$0xff]   ;;  %v2780_v33 = vld [vmem:[#allocation6 + $0x1e8] sm:$0xff]  }
 0x114   :  { %v2530_v41 = vpack.c.bf16 %v780_v37, %v780_v37  ;;  %v2532_v44 = vpack.c.bf16 %v782_v39, %v782_v39 }
 0x116   :  { %1994 = vmatprep.mubr.bf16.mxu0 %v2530_v41  ;;  %2034 = vmatprep.mubr.bf16.mxu1 %v2532_v44 }
 0x117   :  { %1995 = vmatmul.mubr.bf16.vlgmr.msra.gmra.mrb[16].mxu0 %v2529_v43  ;;  %2035 = vmatmul.mubr.bf16.vlgmr.msra.gmra.mrb[16].mxu1 %v2531_v46  ;;  %v2781_v43 = vld [vmem:[#allocation6 + $0x128] sm:$0xff]   ;;  %v2784_v46 = vld [vmem:[#allocation6 + $0x1f0] sm:$0xff]  }
 0x118   :  { %2590 = vmatpush3.bf16.msra.mxu0 %v2761_v42  ;;  %v3036_v51 = vpop.f32.mrb[4].mxu0  ;;  %2612 = vmatpush3.bf16.msra.mxu1 %v2762_v1  ;;  %v592_v35 = vpop.f32.mrb[4].mxu1 }
 0x119   :  { %2591 = vmatprep.subr.bf16.mxu0 %v2763_v45  ;;  %v553_v54 = vpop.f32.mrb[5].mxu0  ;;  %2613 = vmatprep.subr.bf16.mxu1 %v2764_v47  ;;  %v594_v58 = vpop.f32.mrb[5].mxu1  ;;  %v593_v42 = vadd.f32 %v592_v35, %v138_v26  ;;  %v552_v1 = vadd.f32 %v3036_v51, %v130_v29  ;;  %v2782_v45 = vld [vmem:[#allocation6 + $0x1a8] sm:$0xff]   ;;  %v2788_v35 = vld [vmem:[#allocation6 + $0x1f8] sm:$0xff]   ;;  %v2799_v29 = vld [vmem:[#allocation6 + $0x250] sm:$0xff]  }
 0x11a   :  { %v554_v56 = vadd.f32 %v553_v54, %v134_v48  ;;  %v555_v57 = vpop.f32.mrb[6].mxu0  ;;  %v595_v60 = vadd.f32 %v594_v58, %v142_v49  ;;  %v596_v61 = vpop.f32.mrb[6].mxu1  ;;  %v162_v54 = vrot.slane %v3041_v7, %v129_v20  ;;  %v2789_v58 = vld [vmem:[#allocation6 + $0x138] sm:$0xff]  }
 0x11b   :  { %v556_v59 = vpop.f32.mrb[7].mxu0  ;;  %v597_v0 = vpop.f32.mrb[7].mxu1  ;;  %v769_v49 = vmul.f32 0.01, %v593_v42  ;;  %v2790_v61 = vld [vmem:[#allocation6 + $0x1b8] sm:$0xff]  }
 0x11c   :  { %2592 = vmatpush3.bf16.msra.mxu0 %v2765_v50  ;;  %v768_v63 = vmul.f32 0.01, %v554_v56  ;;  %2614 = vmatpush3.bf16.msra.mxu1 %v2766_v52  ;;  %v770_v4 = vmul.f32 0.01, %v595_v60  ;;  %v2785_v50 = vld [vmem:[#allocation6 + $0x130] sm:$0xff]  }
 0x11d   :  { %2593 = vmatprep.subr.bf16.mxu0 %v2767_v53  ;;  %2615 = vmatprep.subr.bf16.mxu1 %v2768_v55  ;;  %v767_v52 = vmul.f32 0.01, %v552_v1  ;;  %v2787_v53 = vld [vmem:[#allocation6 + $0x178] sm:$0xff]   ;;  %v170_v55 = vrot.slane %v3041_v7, %v137_v17  ;;  %v785_v57 = vmax.f32 %v593_v42, %v769_v49  ;;  %v2810_v42 = vld [vmem:[#allocation6 + $0x2a0] sm:$0xff]  }
 0x11e   :  { %v784_v6 = vmax.f32 %v554_v56, %v768_v63  ;;  %v786_v14 = vmax.f32 %v595_v60, %v770_v4 }
 0x11f   :  { %v783_v60 = vmax.f32 %v552_v1, %v767_v52  ;;  %v166_v1 = vrot.slane %v3041_v7, %v133_v38  ;;  %v2817_v38 = vld [vmem:[#allocation6 + $0x230] sm:$0xff]  }
 0x120   :  { %2594 = vmatpush3.bf16.msra.mxu0 %v2769_v62  ;;  %v2534_v16 = vpack.c.bf16 %v784_v6, %v784_v6  ;;  %2616 = vmatpush3.bf16.msra.mxu1 %v2770_v2  ;;  %v2536_v21 = vpack.c.bf16 %v786_v14, %v786_v14  ;;  %v2791_v62 = vld [vmem:[#allocation6 + $0x240] sm:$0xff]  }
 0x121   :  { %2595 = vmatprep.subr.bf16.mxu0 %v2771_v3  ;;  %2617 = vmatprep.subr.bf16.mxu1 %v2772_v5  ;;  %v2792_v3 = vld [vmem:[#allocation6 + $0x2c0] sm:$0xff]  }
 0x122   :  { %2074 = vmatprep.mubr.bf16.mxu0 %v2534_v16  ;;  %2114 = vmatprep.mubr.bf16.mxu1 %v2536_v21  ;;  %v2533_v21 = vpack.c.bf16 %v783_v60, %v783_v60 }
 0x124   :  { %2596 = vmatpush3.bf16.msra.mxu0 %v2773_v15  ;;  %v633_v27 = vpop.f32.mrb[8].mxu0  ;;  %2618 = vmatpush3.bf16.msra.mxu1 %v2774_v18  ;;  %v674_v32 = vpop.f32.mrb[8].mxu1  ;;  %v2535_v18 = vpack.c.bf16 %v785_v57, %v785_v57  ;;  %v2823_v57 = vld [vmem:[#allocation6 + $0x340] sm:$0xff]  }
 0x125   :  { %2597 = vmatprep.subr.bf16.mxu0 %v2775_v19  ;;  %v3053_v9 = vadd.f32 %v633_v27, %v146_v22  ;;  %v635_v31 = vpop.f32.mrb[9].mxu0  ;;  %2619 = vmatprep.subr.bf16.mxu1 %v2776_v23  ;;  %v3058_v36 = vadd.f32 %v674_v32, %v154_v24  ;;  %v676_v37 = vpop.f32.mrb[9].mxu1  ;;  %v2793_v19 = vld [vmem:[#allocation6 + $0x200] sm:$0xff]   ;;  %v2795_v23 = vld [vmem:[#allocation6 + $0x248] sm:$0xff]   ;;  %v2802_v32 = vld [vmem:[#allocation6 + $0x290] sm:$0xff]  }
 0x126   :  { %v637_v34 = vpop.f32.mrb[10].mxu0  ;;  %v678_v41 = vpop.f32.mrb[10].mxu1  ;;  %v636_v47 = vadd.f32 %v635_v31, %v150_v11  ;;  %v677_v48 = vadd.f32 %v676_v37, %v158_v10  ;;  %v2794_v22 = vld [vmem:[#allocation6 + $0x280] sm:$0xff]   ;;  %v2796_v24 = vld [vmem:[#allocation6 + $0x2c8] sm:$0xff]   ;;  %v2801_v31 = vld [vmem:[#allocation6 + $0x210] sm:$0xff]  }
 0x127   :  { %v638_v39 = vpop.f32.mrb[11].mxu0  ;;  %v679_v44 = vpop.f32.mrb[11].mxu1  ;;  %v2797_v27 = vld [vmem:[#allocation6 + $0x208] sm:$0xff]   ;;  %v2804_v11 = vld [vmem:[#allocation6 + $0x2d8] sm:$0xff]   ;;  %v2808_v10 = vld [vmem:[#allocation6 + $0x2e0] sm:$0xff]  }
 0x128   :  { %2598 = vmatpush3.bf16.msra.mxu0 %v2777_v25  ;;  %2620 = vmatpush3.bf16.msra.mxu1 %v2778_v28  ;;  %v772_v51 = vmul.f32 0.01, %v636_v47  ;;  %v774_v56 = vmul.f32 0.01, %v677_v48  ;;  %v2798_v28 = vld [vmem:[#allocation6 + $0x288] sm:$0xff]   ;;  %v2805_v34 = vld [vmem:[#allocation6 + $0x218] sm:$0xff]  }
 0x129   :  { %2599 = vmatprep.subr.bf16.mxu0 %v2779_v30  ;;  %2621 = vmatprep.subr.bf16.mxu1 %v2780_v33  ;;  %v2800_v30 = vld [vmem:[#allocation6 + $0x2d0] sm:$0xff]   ;;  %v2803_v33 = vld [vmem:[#allocation6 + $0x258] sm:$0xff]   ;;  %v2807_v39 = vld [vmem:[#allocation6 + $0x260] sm:$0xff]   ;;  %v773_v52 = vmul.f32 0.01, %v3058_v36 }
 0x12a   :  { %v788_v4 = vmax.f32 %v636_v47, %v772_v51  ;;  %v790_v15 = vmax.f32 %v677_v48, %v774_v56  ;;  %v2806_v37 = vld [vmem:[#allocation6 + $0x298] sm:$0xff]   ;;  %v2809_v41 = vld [vmem:[#allocation6 + $0x220] sm:$0xff]   ;;  %v2812_v44 = vld [vmem:[#allocation6 + $0x2e8] sm:$0xff]   ;;  %v771_v8 = vmul.f32 0.01, %v3053_v9 }
 0x12b   :  { %v2815_v47 = vld [vmem:[#allocation6 + $0x270] sm:$0xff]   ;;  %v2821_v51 = vld [vmem:[#allocation6 + $0x238] sm:$0xff]  }
 0x12c   :  { %2600 = vmatpush3.bf16.msra.mxu0 %v2781_v43  ;;  %2622 = vmatpush3.bf16.msra.mxu1 %v2782_v45  ;;  %v2538_v25 = vpack.c.bf16 %v788_v4, %v788_v4  ;;  %v2540_v26 = vpack.c.bf16 %v790_v15, %v790_v15  ;;  %v2811_v43 = vld [vmem:[#allocation6 + $0x268] sm:$0xff]   ;;  %v174_v45 = vrot.slane %v3041_v7, %v141_v40  ;;  %v2816_v48 = vld [vmem:[#allocation6 + $0x2f0] sm:$0xff]   ;;  %v2819_v7 = vld [vmem:[#allocation6 + $0x278] sm:$0xff]  }
 0x12d   :  { %2601 = vmatprep.subr.bf16.mxu0 %v2783_v12  ;;  %2623 = vmatprep.subr.bf16.mxu1 %v2784_v46  ;;  %v2813_v12 = vld [vmem:[#allocation6 + $0x228] sm:$0xff]   ;;  %v2818_v40 = vld [vmem:[#allocation6 + $0x2b0] sm:$0xff]   ;;  %v2822_v56 = vld [vmem:[#allocation6 + $0x2b8] sm:$0xff]  }
 0x12e   :  { %v2814_v46 = vld [vmem:[#allocation6 + $0x2a8] sm:$0xff]   ;;  %v2831_v15 = vld [vmem:[#allocation6 + $0x350] sm:$0xff]  }
 0x130   :  { %2602 = vmatpush3.bf16.msra.mxu0 %v2785_v50  ;;  %v715_v59 = vpop.f32.mrb[12].mxu0  ;;  %2624 = vmatpush3.bf16.msra.mxu1 %v2786_v13  ;;  %v756_v2 = vpop.f32.mrb[12].mxu1  ;;  %v2820_v13 = vld [vmem:[#allocation6 + $0x2f8] sm:$0xff]  }
 0x131   :  { %2603 = vmatprep.subr.bf16.mxu0 %v2787_v53  ;;  %v3066_v63 = vadd.f32 %v715_v59, %v162_v54  ;;  %v3068_v0 = vpop.f32.mrb[13].mxu0  ;;  %2625 = vmatprep.subr.bf16.mxu1 %v2788_v35  ;;  %v3070_v6 = vadd.f32 %v756_v2, %v170_v55  ;;  %v3072_v14 = vpop.f32.mrb[13].mxu1  ;;  %v789_v35 = vmax.f32 %v3058_v36, %v773_v52  ;;  %v2826_v2 = vld [vmem:[#allocation6 + $0x380] sm:$0xff]   ;;  %v2827_v36 = vld [vmem:[#allocation6 + $0x348] sm:$0xff]  }
 0x132   :  { %v719_v5 = vpop.f32.mrb[14].mxu0  ;;  %v760_v17 = vpop.f32.mrb[14].mxu1  ;;  %v718_v49 = vadd.f32 %v3068_v0, %v166_v1  ;;  %v759_v50 = vadd.f32 %v3072_v14, %v174_v45  ;;  %v787_v55 = vmax.f32 %v3053_v9, %v771_v8  ;;  %v2830_v14 = vld [vmem:[#allocation6 + $0x388] sm:$0xff]  }
 0x133   :  { %v720_v16 = vpop.f32.mrb[15].mxu0  ;;  %v761_v20 = vpop.f32.mrb[15].mxu1  ;;  %v2829_v5 = vld [vmem:[#allocation6 + $0x308] sm:$0xff]   ;;  %v2833_v17 = vld [vmem:[#allocation6 + $0x310] sm:$0xff]  }
 0x134   :  { %2604 = vmatpush3.bf16.msra.mxu0 %v2789_v58  ;;  %2626 = vmatpush3.bf16.msra.mxu1 %v2790_v61  ;;  %v776_v53 = vmul.f32 0.01, %v718_v49  ;;  %v778_v54 = vmul.f32 0.01, %v759_v50  ;;  %v2824_v58 = vld [vmem:[#allocation6 + $0x3c0] sm:$0xff]   ;;  %v2539_v61 = vpack.c.bf16 %v789_v35, %v789_v35  ;;  %v2537_v0 = vpack.c.bf16 %v787_v55, %v787_v55  ;;  %v2832_v16 = vld [vmem:[#allocation6 + $0x3d0] sm:$0xff]  }
 0x135   :  { %2633 = vmatprep.subr.bf16.mxu0 %v2791_v62  ;;  %2655 = vmatprep.subr.bf16.mxu1 %v2792_v3  ;;  %v2825_v62 = vld [vmem:[#allocation6 + $0x300] sm:$0xff]   ;;  %v2828_v3 = vld [vmem:[#allocation6 + $0x3c8] sm:$0xff]   ;;  %v2836_v20 = vld [vmem:[#allocation6 + $0x3d8] sm:$0xff]  }
 0x136   :  { %v792_v59 = vmax.f32 %v718_v49, %v776_v53  ;;  %v794_v60 = vmax.f32 %v759_v50, %v778_v54 }
 0x137   :  { %2075 = vmatmul.mubr.bf16.vlgmr.msra.gmra.mrb[20].mxu0 %v2533_v21  ;;  %2115 = vmatmul.mubr.bf16.vlgmr.msra.gmra.mrb[20].mxu1 %v2535_v18  ;;  %v2834_v18 = vld [vmem:[#allocation6 + $0x390] sm:$0xff]   ;;  %v2837_v21 = vld [vmem:[#allocation6 + $0x318] sm:$0xff]  }
 0x138   :  { %2634 = vmatpush3.bf16.msra.mxu0 %v2793_v19  ;;  %2656 = vmatpush3.bf16.msra.mxu1 %v2794_v22  ;;  %v2542_v4 = vpack.c.bf16 %v792_v59, %v792_v59  ;;  %v2544_v9 = vpack.c.bf16 %v794_v60, %v794_v60  ;;  %v2835_v19 = vld [vmem:[#allocation6 + $0x358] sm:$0xff]  }
 0x139   :  { %2635 = vmatprep.subr.bf16.mxu0 %v2795_v23  ;;  %2657 = vmatprep.subr.bf16.mxu1 %v2796_v24  ;;  %v2838_v22 = vld [vmem:[#allocation6 + $0x398] sm:$0xff]   ;;  %v2839_v23 = vld [vmem:[#allocation6 + $0x360] sm:$0xff]  }
 0x13a   :  { %2154 = vmatprep.mubr.bf16.mxu0 %v2538_v25  ;;  %2194 = vmatprep.mubr.bf16.mxu1 %v2540_v26  ;;  %v2840_v24 = vld [vmem:[#allocation6 + $0x3e0] sm:$0xff]  }
 0x13b   :  { %v2841_v25 = vld [vmem:[#allocation6 + $0x320] sm:$0xff]  }
 0x13c   :  { %2636 = vmatpush3.bf16.msra.mxu0 %v2797_v27  ;;  %2658 = vmatpush3.bf16.msra.mxu1 %v2798_v28  ;;  %v2842_v26 = vld [vmem:[#allocation6 + $0x3a0] sm:$0xff]   ;;  %v2843_v27 = vld [vmem:[#allocation6 + $0x368] sm:$0xff]  }
 0x13d   :  { %2637 = vmatprep.subr.bf16.mxu0 %v2799_v29  ;;  %2659 = vmatprep.subr.bf16.mxu1 %v2800_v30  ;;  %v2844_v28 = vld [vmem:[#allocation6 + $0x3e8] sm:$0xff]  }
 0x13e   :  { %v2845_v29 = vld [vmem:[#allocation6 + $0x328] sm:$0xff]  }
 0x13f   :  { %v2846_v30 = vld [vmem:[#allocation6 + $0x3a8] sm:$0xff]  }
 0x140   :  { %2638 = vmatpush3.bf16.msra.mxu0 %v2801_v31  ;;  %2660 = vmatpush3.bf16.msra.mxu1 %v2802_v32  ;;  %v2847_v31 = vld [vmem:[#allocation6 + $0x370] sm:$0xff]  }
 0x141   :  { %2639 = vmatprep.subr.bf16.mxu0 %v2803_v33  ;;  %2661 = vmatprep.subr.bf16.mxu1 %v2804_v11  ;;  %v2848_v32 = vld [vmem:[#allocation6 + $0x3f0] sm:$0xff]   ;;  %v775_v11 = vmul.f32 0.01, %v3066_v63 }
 0x142   :  { %v2849_v33 = vld [vmem:[#allocation6 + $0x330] sm:$0xff]  }
 0x144   :  { %2640 = vmatpush3.bf16.msra.mxu0 %v2805_v34  ;;  %2662 = vmatpush3.bf16.msra.mxu1 %v2806_v37  ;;  %v2850_v34 = vld [vmem:[#allocation6 + $0x3b0] sm:$0xff]   ;;  %v2851_v37 = vld [vmem:[#allocation6 + $0x378] sm:$0xff]  }
 0x145   :  { %2641 = vmatprep.subr.bf16.mxu0 %v2807_v39  ;;  %2663 = vmatprep.subr.bf16.mxu1 %v2808_v10  ;;  %v777_v39 = vmul.f32 0.01, %v3070_v6  ;;  %v2852_v10 = vld [vmem:[#allocation6 + $0x3f8] sm:$0xff]  }
 0x148   :  { %2642 = vmatpush3.bf16.msra.mxu0 %v2809_v41  ;;  %2664 = vmatpush3.bf16.msra.mxu1 %v2810_v42  ;;  %v2853_v41 = vld [vmem:[#allocation6 + $0x338] sm:$0xff]   ;;  %v791_v42 = vmax.f32 %v3066_v63, %v775_v11 }
 0x149   :  { %2643 = vmatprep.subr.bf16.mxu0 %v2811_v43  ;;  %2665 = vmatprep.subr.bf16.mxu1 %v2812_v44  ;;  %v2854_v43 = vld [vmem:[#allocation6 + $0x3b8] sm:$0xff]   ;;  %v793_v44 = vmax.f32 %v3070_v6, %v777_v39 }
 0x14a   :  { %v2541_v1 = vpack.c.bf16 %v791_v42, %v791_v42  ;;  %v2520_v11 = vld [vmem:[#allocation3] ss:$0 sm:$0xff] }
 0x14b   :  { %v2543_v45 = vpack.c.bf16 %v793_v44, %v793_v44 }
 0x14c   :  { %2644 = vmatpush3.bf16.msra.mxu0 %v2813_v12  ;;  %2666 = vmatpush3.bf16.msra.mxu1 %v2814_v46 }
 0x14d   :  { %2645 = vmatprep.subr.bf16.mxu0 %v2815_v47  ;;  %2667 = vmatprep.subr.bf16.mxu1 %v2816_v48  ;;  %v2374_v47 = vld [vmem:[%s3103_s4] ss:$0 sm:$0xff] }
 0x150   :  { %2646 = vmatpush3.bf16.msra.mxu0 %v2817_v38  ;;  %2668 = vmatpush3.bf16.msra.mxu1 %v2818_v40 }
 0x151   :  { %2647 = vmatprep.subr.bf16.mxu0 %v2819_v7  ;;  %2669 = vmatprep.subr.bf16.mxu1 %v2820_v13 }
 0x154   :  { %2648 = vmatpush3.bf16.msra.mxu0 %v2821_v51  ;;  %2670 = vmatpush3.bf16.msra.mxu1 %v2822_v56 }
 0x155   :  { %2677 = vmatprep.subr.bf16.mxu0 %v2823_v57  ;;  %2699 = vmatprep.subr.bf16.mxu1 %v2824_v58 }
 0x157   :  { %2155 = vmatmul.mubr.bf16.vlgmr.msra.gmra.mrb[24].mxu0 %v2537_v0  ;;  %2195 = vmatmul.mubr.bf16.vlgmr.msra.gmra.mrb[24].mxu1 %v2539_v61 }
 0x158   :  { %2678 = vmatpush3.bf16.msra.mxu0 %v2825_v62  ;;  %2700 = vmatpush3.bf16.msra.mxu1 %v2826_v2 }
 0x159   :  { %2679 = vmatprep.subr.bf16.mxu0 %v2827_v36  ;;  %2701 = vmatprep.subr.bf16.mxu1 %v2828_v3 }
 0x15a   :  { %2234 = vmatprep.mubr.bf16.mxu0 %v2542_v4  ;;  %2274 = vmatprep.mubr.bf16.mxu1 %v2544_v9 }
 0x15c   :  { %2680 = vmatpush3.bf16.msra.mxu0 %v2829_v5  ;;  %2702 = vmatpush3.bf16.msra.mxu1 %v2830_v14 }
 0x15d   :  { %2681 = vmatprep.subr.bf16.mxu0 %v2831_v15  ;;  %2703 = vmatprep.subr.bf16.mxu1 %v2832_v16 }
 0x160   :  { %2682 = vmatpush3.bf16.msra.mxu0 %v2833_v17  ;;  %2704 = vmatpush3.bf16.msra.mxu1 %v2834_v18 }
 0x161   :  { %2683 = vmatprep.subr.bf16.mxu0 %v2835_v19  ;;  %2705 = vmatprep.subr.bf16.mxu1 %v2836_v20 }
 0x164   :  { %2684 = vmatpush3.bf16.msra.mxu0 %v2837_v21  ;;  %2706 = vmatpush3.bf16.msra.mxu1 %v2838_v22 }
 0x165   :  { %2685 = vmatprep.subr.bf16.mxu0 %v2839_v23  ;;  %2707 = vmatprep.subr.bf16.mxu1 %v2840_v24 }
 0x168   :  { %2686 = vmatpush3.bf16.msra.mxu0 %v2841_v25  ;;  %2708 = vmatpush3.bf16.msra.mxu1 %v2842_v26 }
 0x169   :  { %2687 = vmatprep.subr.bf16.mxu0 %v2843_v27  ;;  %2709 = vmatprep.subr.bf16.mxu1 %v2844_v28 }
 0x16c   :  { %2688 = vmatpush3.bf16.msra.mxu0 %v2845_v29  ;;  %2710 = vmatpush3.bf16.msra.mxu1 %v2846_v30 }
 0x16d   :  { %2689 = vmatprep.subr.bf16.mxu0 %v2847_v31  ;;  %2711 = vmatprep.subr.bf16.mxu1 %v2848_v32  ;;  %v2519_v31 = vld [vmem:[%s3104_s5] ss:$0 sm:$0xff] }
 0x170   :  { %2690 = vmatpush3.bf16.msra.mxu0 %v2849_v33  ;;  %2712 = vmatpush3.bf16.msra.mxu1 %v2850_v34 }
 0x171   :  { %2691 = vmatprep.subr.bf16.mxu0 %v2851_v37  ;;  %2713 = vmatprep.subr.bf16.mxu1 %v2852_v10 }
 0x174   :  { %2692 = vmatpush3.bf16.msra.mxu0 %v2853_v41  ;;  %2714 = vmatpush3.bf16.msra.mxu1 %v2854_v43 }
 0x177   :  { %2235 = vmatmul.mubr.bf16.vlgmr.msra.gmra.mrb[28].mxu0 %v2541_v1  ;;  %2275 = vmatmul.mubr.bf16.vlgmr.msra.gmra.mrb[28].mxu1 %v2543_v45 }
 0x1ea   :  { %v2561_v12 = vpop.f32.mrb[16].mxu0  ;;  %v2583_v46 = vpop.f32.mrb[16].mxu1 }
 0x1eb   :  { %v2562_v48 = vpop.f32.mrb[17].mxu0  ;;  %v2584_v49 = vpop.f32.mrb[17].mxu1 }
 0x1ec   :  { %v2563_v63 = vadd.f32 %v2562_v48, %v2561_v12  ;;  %v2564_v50 = vpop.f32.mrb[18].mxu0  ;;  %v2585_v52 = vadd.f32 %v2584_v49, %v2583_v46  ;;  %v2586_v38 = vpop.f32.mrb[18].mxu1 }
 0x1ed   :  { %v2565_v6 = vpop.f32.mrb[19].mxu0  ;;  %v2587_v40 = vpop.f32.mrb[19].mxu1 }
 0x1ee   :  { %v1997_v8 = vadd.f32 %v2563_v63, %v2374_v47 }
 0x1f0   :  { %v2037_v7 = vadd.f32 %v2585_v52, %v1997_v8 }
 0x20a   :  { %v2605_v13 = vpop.f32.mrb[20].mxu0  ;;  %v2627_v53 = vpop.f32.mrb[20].mxu1 }
 0x20b   :  { %v2606_v54 = vpop.f32.mrb[21].mxu0  ;;  %v2628_v51 = vpop.f32.mrb[21].mxu1 }
 0x20c   :  { %v2607_v35 = vadd.f32 %v2606_v54, %v2605_v13  ;;  %v2608_v55 = vpop.f32.mrb[22].mxu0  ;;  %v2629_v56 = vadd.f32 %v2628_v51, %v2627_v53  ;;  %v2630_v57 = vpop.f32.mrb[22].mxu1 }
 0x20d   :  { %v2609_v58 = vpop.f32.mrb[23].mxu0  ;;  %v2631_v60 = vpop.f32.mrb[23].mxu1 }
 0x20e   :  { %v2077_v59 = vadd.f32 %v2607_v35, %v2037_v7 }
 0x210   :  { %v2117_v61 = vadd.f32 %v2629_v56, %v2077_v59 }
 0x22a   :  { %v2649_v62 = vpop.f32.mrb[24].mxu0  ;;  %v2671_v0 = vpop.f32.mrb[24].mxu1 }
 0x22b   :  { %v2650_v2 = vpop.f32.mrb[25].mxu0  ;;  %v2672_v3 = vpop.f32.mrb[25].mxu1 }
 0x22c   :  { %v2651_v36 = vadd.f32 %v2650_v2, %v2649_v62  ;;  %v2652_v4 = vpop.f32.mrb[26].mxu0  ;;  %v2673_v9 = vadd.f32 %v2672_v3, %v2671_v0  ;;  %v2674_v5 = vpop.f32.mrb[26].mxu1 }
 0x22d   :  { %v2653_v14 = vpop.f32.mrb[27].mxu0  ;;  %v2675_v16 = vpop.f32.mrb[27].mxu1 }
 0x22e   :  { %v2157_v15 = vadd.f32 %v2651_v36, %v2117_v61 }
 0x230   :  { %v2197_v17 = vadd.f32 %v2673_v9, %v2157_v15 }
 0x24a   :  { %v2693_v18 = vpop.f32.mrb[28].mxu0  ;;  %v2715_v19 = vpop.f32.mrb[28].mxu1 }
 0x24b   :  { %v2694_v20 = vpop.f32.mrb[29].mxu0  ;;  %v2716_v22 = vpop.f32.mrb[29].mxu1 }
 0x24c   :  { %v2695_v21 = vadd.f32 %v2694_v20, %v2693_v18  ;;  %v2696_v23 = vpop.f32.mrb[30].mxu0  ;;  %v2717_v24 = vadd.f32 %v2716_v22, %v2715_v19  ;;  %v2718_v25 = vpop.f32.mrb[30].mxu1 }
 0x24d   :  { %v2697_v26 = vpop.f32.mrb[31].mxu0  ;;  %v2719_v28 = vpop.f32.mrb[31].mxu1 }
 0x24e   :  { %v2237_v27 = vadd.f32 %v2695_v21, %v2197_v17 }
 0x250   :  { %v2277_v29 = vadd.f32 %v2717_v24, %v2237_v27 }
 0x252   :  { %v2282_v30 = vmul.f32 0.01, %v2277_v29 }
 0x254   :  { %v2283_v32 = vmax.f32 %v2277_v29, %v2282_v30 }
 0x256   :  { %v2291_v33 = vmul.f32 %v2519_v31, %v2283_v32 }
 0x258   :  { %2292 = vadd.xlane.f32.xlu0 %v2291_v33 }
 0x2e5   :  { %v2293_v34 = vpop.xlane.xlu0 %2292 }
 0x2e6   :  { %v2301_v37 = vadd.f32 %v2520_v11, %v2293_v34 }
 0x2e8   :  { %2303 = vst.msk [vmem:[%s3106_s7] sm:$0xff] %vm2302_vm1, %v2301_v37 }
 0x2e9   :  { %2308 = vsyncpa [#allocation5], 1 }
 0x2ea   :  { %2309 = vsyncpa [#allocation7], 1 }

</bundles_post_ra>
